<compile_context>
chip_gen: v6e
topology: v6e:2x2x1
jax: 0.10.0
libtpu: 0.0.40
codegen_flags: <defaults>
</compile_context>

<pallas_src>
import jax
import jax.numpy as jnp
from jax import lax
from jax.experimental import pallas as pl
from jax.experimental.pallas import tpu as pltpu

# Small, module-consistent shapes: mid_channels == out_channels // 4.
N, H, W = 2, 16, 16
CIN, CMID, COUT = 8, 8, 32
NH = N * H                      # rows of the 2-D layout
LIN = W * CIN                   # 128 lanes
LMID = W * CMID                 # 128 lanes
LOUT = W * COUT                 # 512 lanes
BN_EPS = 1e-5


def resbottleneck_kernel(x_ref, w1_ref, b1_ref, sup_ref, sdn_ref,
                         w2_ref, b2_ref, w3_ref, wp_ref, bres_ref, o_ref):
    x = x_ref[...]                                              # (NH, LIN)

    # --- conv1 (1x1, BN1 folded) as block-diag matmul + bias + ReLU ---
    y1 = jnp.dot(x, w1_ref[...], preferred_element_type=jnp.float32)
    y1 = jnp.maximum(y1 + b1_ref[...], 0.0)                     # (NH, LMID)

    # --- conv2 (3x3 'same', BN2 folded) ---
    # H-direction +-1 shifts (with image/batch boundary zeroing) via tiny
    # precomputed shift matrices; W-direction taps + padding are baked into
    # the banded (LMID, LMID) weight blocks.
    up = jnp.dot(sup_ref[...], y1, preferred_element_type=jnp.float32)
    dn = jnp.dot(sdn_ref[...], y1, preferred_element_type=jnp.float32)
    y2 = (jnp.dot(up, w2_ref[0], preferred_element_type=jnp.float32)
          + jnp.dot(y1, w2_ref[1], preferred_element_type=jnp.float32)
          + jnp.dot(dn, w2_ref[2], preferred_element_type=jnp.float32))
    y2 = jnp.maximum(y2 + b2_ref[...], 0.0)                     # (NH, LMID)

    # --- conv3 + BN3, projection shortcut, residual add, final ReLU ---
    out = (jnp.dot(y2, w3_ref[...], preferred_element_type=jnp.float32)
           + jnp.dot(x, wp_ref[...], preferred_element_type=jnp.float32)
           + bres_ref[...])                                     # (NH, LOUT)
    o_ref[...] = jnp.maximum(out, 0.0).astype(o_ref.dtype)


def resbottleneck_pallas(x_nhwc, kp):
    x2d = x_nhwc.reshape(NH, LIN)
    args = (x2d, kp['w1'], kp['b1'], kp['sup'], kp['sdn'],
            kp['w2'], kp['b2'], kp['w3'], kp['wp'], kp['bres'])

    def full_spec(a):
        return pl.BlockSpec(a.shape, lambda i, _nd=a.ndim: (0,) * _nd)

    out2d = pl.pallas_call(
        resbottleneck_kernel,
        out_shape=jax.ShapeDtypeStruct((NH, LOUT), jnp.float32),
        grid=(1,),
        in_specs=[full_spec(a) for a in args],
        out_specs=pl.BlockSpec((NH, LOUT), lambda i: (0, 0)),
        compiler_params=pltpu.CompilerParams(
            dimension_semantics=("arbitrary",)),
    )(*args)
    return out2d.reshape(N, H, W, COUT)


def make_params(key):
    ks = jax.random.split(key, 20)
    p = {}
    # PyTorch-layout conv weights (O, I, kH, kW)
    p['w1_oihw'] = 0.2 * jax.random.normal(ks[0], (CMID, CIN, 1, 1), jnp.float32)
    p['w2_oihw'] = 0.2 * jax.random.normal(ks[1], (CMID, CMID, 3, 3), jnp.float32)
    p['w3_oihw'] = 0.2 * jax.random.normal(ks[2], (COUT, CMID, 1, 1), jnp.float32)
    p['wp_oihw'] = 0.2 * jax.random.normal(ks[3], (COUT, CIN, 1, 1), jnp.float32)
    p['bp'] = 0.1 * jax.random.normal(ks[4], (COUT,), jnp.float32)

    def bn(kg, kb, km, kv, c):
        gamma = jax.random.uniform(kg, (c,), jnp.float32, 0.5, 1.5)
        beta = 0.1 * jax.random.normal(kb, (c,), jnp.float32)
        mean = 0.1 * jax.random.normal(km, (c,), jnp.float32)
        var = jax.random.uniform(kv, (c,), jnp.float32, 0.5, 1.5)
        return gamma, beta, mean, var

    p['bn1'] = bn(ks[5], ks[6], ks[7], ks[8], CMID)
    p['bn2'] = bn(ks[9], ks[10], ks[11], ks[12], CMID)
    p['bn3'] = bn(ks[13], ks[14], ks[15], ks[16], COUT)
    return p


def fold_for_kernel(p):
    """Fold BN (eval semantics) into weights; build lane-dense fused operands."""
    def fold_bn(bn):
        gamma, beta, mean, var = bn
        s = gamma / jnp.sqrt(var + BN_EPS)
        return s, beta - mean * s

    s1, b1 = fold_bn(p['bn1'])
    s2, b2 = fold_bn(p['bn2'])
    s3, b3 = fold_bn(p['bn3'])

    eye_w = jnp.eye(W, dtype=jnp.float32)

    # 1x1 convs -> block-diagonal matmuls over the (w, c) lane layout.
    w1_small = p['w1_oihw'][:, :, 0, 0].T * s1[None, :]          # (CIN, CMID)
    w3_small = p['w3_oihw'][:, :, 0, 0].T * s3[None, :]          # (CMID, COUT)
    wp_small = p['wp_oihw'][:, :, 0, 0].T                        # (CIN, COUT)

    # 3x3 conv: per-dy banded weight block; W-direction taps & 'same' padding
    # live in the band structure (block (w_in, w_out) = tap dx = w_in-w_out+1).
    taps = jnp.transpose(p['w2_oihw'], (2, 3, 1, 0)) * s2        # (3,3,ci,co)
    bands = []
    for dy in range(3):
        band = jnp.zeros((LMID, LMID), jnp.float32)
        for dx in range(3):
            band = band + jnp.kron(jnp.eye(W, k=1 - dx, dtype=jnp.float32),
                                   taps[dy, dx])
        bands.append(band)
    w2_stack = jnp.stack(bands, axis=0)                          # (3, 128, 128)

    # Row-shift (+ image/batch boundary zeroing) matrices for the H direction.
    sup = jnp.kron(jnp.eye(N, dtype=jnp.float32),
                   jnp.eye(H, k=-1, dtype=jnp.float32))          # row r <- r-1
    sdn = jnp.kron(jnp.eye(N, dtype=jnp.float32),
                   jnp.eye(H, k=1, dtype=jnp.float32))           # row r <- r+1

    return {
        'w1': jnp.kron(eye_w, w1_small),                         # (128, 128)
        'b1': jnp.tile(b1, W).reshape(1, LMID),
        'sup': sup, 'sdn': sdn,                                  # (32, 32)
        'w2': w2_stack,                                          # (3, 128, 128)
        'b2': jnp.tile(b2, W).reshape(1, LMID),
        'w3': jnp.kron(eye_w, w3_small),                         # (128, 512)
        'wp': jnp.kron(eye_w, wp_small),                         # (128, 512)
        'bres': jnp.tile(b3 + p['bp'], W).reshape(1, LOUT),      # (1, 512)
    }


def ref_forward(x_nchw, p):
    """Pure-JAX reference matching PyTorch eval-mode semantics (NCHW)."""
    def conv(x, w):
        return lax.conv_general_dilated(
            x, w, (1, 1), 'SAME',
            dimension_numbers=('NCHW', 'OIHW', 'NCHW'))

    def bn(x, params):
        gamma, beta, mean, var = params
        s = gamma / jnp.sqrt(var + BN_EPS)
        return x * s[None, :, None, None] + (beta - mean * s)[None, :, None, None]

    y = jnp.maximum(bn(conv(x_nchw, p['w1_oihw']), p['bn1']), 0.0)
    y = jnp.maximum(bn(conv(y, p['w2_oihw']), p['bn2']), 0.0)
    y = bn(conv(y, p['w3_oihw']), p['bn3'])
    shortcut = conv(x_nchw, p['wp_oihw']) + p['bp'][None, :, None, None]
    return jnp.maximum(y + shortcut, 0.0)


if __name__ == "__main__":
    key = jax.random.PRNGKey(0)
    kx, kp = jax.random.split(key)
    x_nchw = jax.random.normal(kx, (N, CIN, H, W), jnp.float32)

    params = make_params(kp)
    kparams = fold_for_kernel(params)

    # NCHW -> NHWC for the kernel layout.
    x_nhwc = jnp.transpose(x_nchw, (0, 2, 3, 1))
    out_nhwc = resbottleneck_pallas(x_nhwc, kparams)
    out_nchw = jnp.transpose(out_nhwc, (0, 3, 1, 2))
    jax.block_until_ready(out_nchw)

    expected = ref_forward(x_nchw, params)
    err = float(jnp.max(jnp.abs(out_nchw - expected)))
    assert err < 5e-4, f"max abs error too large: {err}"
    print("KERNEL_OK")
</pallas_src>

<mosaic_0001>
module attributes {stable_mosaic.version = 11 : i64} {
  func.func @resbottleneck_kernel(%arg0: i32, %arg1: memref<32x128xf32, #tpu.memory_space<vmem>>, %arg2: memref<128x128xf32, #tpu.memory_space<vmem>>, %arg3: memref<1x128xf32, #tpu.memory_space<vmem>>, %arg4: memref<32x32xf32, #tpu.memory_space<vmem>>, %arg5: memref<32x32xf32, #tpu.memory_space<vmem>>, %arg6: memref<3x128x128xf32, #tpu.memory_space<vmem>>, %arg7: memref<1x128xf32, #tpu.memory_space<vmem>>, %arg8: memref<128x512xf32, #tpu.memory_space<vmem>>, %arg9: memref<128x512xf32, #tpu.memory_space<vmem>>, %arg10: memref<1x512xf32, #tpu.memory_space<vmem>>, %arg11: memref<32x512xf32, #tpu.memory_space<vmem>>) attributes {dimension_semantics = [#tpu.dimension_semantics<arbitrary>], iteration_bounds = array<i64: 1>, scalar_prefetch = 0 : i64, scratch_operands = 0 : i64, tpu.core_type = #tpu.core_type<tc>, window_params = [{pipeline_mode = #tpu.pipeline_mode<synchronous>, transform_indices = @transform_0, window_bounds = array<i64: 32, 128>}, {pipeline_mode = #tpu.pipeline_mode<synchronous>, transform_indices = @transform_1, window_bounds = array<i64: 128, 128>}, {pipeline_mode = #tpu.pipeline_mode<synchronous>, transform_indices = @transform_2, window_bounds = array<i64: 1, 128>}, {pipeline_mode = #tpu.pipeline_mode<synchronous>, transform_indices = @transform_3, window_bounds = array<i64: 32, 32>}, {pipeline_mode = #tpu.pipeline_mode<synchronous>, transform_indices = @transform_4, window_bounds = array<i64: 32, 32>}, {pipeline_mode = #tpu.pipeline_mode<synchronous>, transform_indices = @transform_5, window_bounds = array<i64: 3, 128, 128>}, {pipeline_mode = #tpu.pipeline_mode<synchronous>, transform_indices = @transform_6, window_bounds = array<i64: 1, 128>}, {pipeline_mode = #tpu.pipeline_mode<synchronous>, transform_indices = @transform_7, window_bounds = array<i64: 128, 512>}, {pipeline_mode = #tpu.pipeline_mode<synchronous>, transform_indices = @transform_8, window_bounds = array<i64: 128, 512>}, {pipeline_mode = #tpu.pipeline_mode<synchronous>, transform_indices = @transform_9, window_bounds = array<i64: 1, 512>}, {pipeline_mode = #tpu.pipeline_mode<synchronous>, transform_indices = @transform_10, window_bounds = array<i64: 32, 512>}]} {
    %c0 = arith.constant 0 : index
    %c0_0 = arith.constant 0 : index
    %0 = vector.load %arg1[%c0, %c0_0] : memref<32x128xf32, #tpu.memory_space<vmem>>, vector<32x128xf32>
    %c0_1 = arith.constant 0 : index
    %c0_2 = arith.constant 0 : index
    %1 = vector.load %arg2[%c0_1, %c0_2] : memref<128x128xf32, #tpu.memory_space<vmem>>, vector<128x128xf32>
    %cst = arith.constant dense<0.000000e+00> : vector<32x128xf32>
    %2 = tpu.matmul %0, %1, %cst {dimension_numbers = #tpu.dot_dimension_numbers<[1], [0], [0], [1], [0, 0, 1, 1], [], []>} : vector<32x128xf32>, vector<128x128xf32>, vector<32x128xf32> -> vector<32x128xf32>
    %c0_3 = arith.constant 0 : index
    %c0_4 = arith.constant 0 : index
    %3 = vector.load %arg3[%c0_3, %c0_4] : memref<1x128xf32, #tpu.memory_space<vmem>>, vector<1x128xf32>
    %4 = vector.broadcast %3 : vector<1x128xf32> to vector<32x128xf32>
    %5 = arith.addf %2, %4 : vector<32x128xf32>
    %cst_5 = arith.constant 0.000000e+00 : f32
    %6 = vector.broadcast %cst_5 : f32 to vector<32x128xf32>
    %7 = arith.maximumf %5, %6 : vector<32x128xf32>
    %c0_6 = arith.constant 0 : index
    %c0_7 = arith.constant 0 : index
    %8 = vector.load %arg4[%c0_6, %c0_7] : memref<32x32xf32, #tpu.memory_space<vmem>>, vector<32x32xf32>
    %cst_8 = arith.constant dense<0.000000e+00> : vector<32x128xf32>
    %9 = tpu.matmul %8, %7, %cst_8 {dimension_numbers = #tpu.dot_dimension_numbers<[1], [0], [0], [1], [0, 0, 1, 1], [], []>} : vector<32x32xf32>, vector<32x128xf32>, vector<32x128xf32> -> vector<32x128xf32>
    %c0_9 = arith.constant 0 : index
    %c0_10 = arith.constant 0 : index
    %10 = vector.load %arg5[%c0_9, %c0_10] : memref<32x32xf32, #tpu.memory_space<vmem>>, vector<32x32xf32>
    %cst_11 = arith.constant dense<0.000000e+00> : vector<32x128xf32>
    %11 = tpu.matmul %10, %7, %cst_11 {dimension_numbers = #tpu.dot_dimension_numbers<[1], [0], [0], [1], [0, 0, 1, 1], [], []>} : vector<32x32xf32>, vector<32x128xf32>, vector<32x128xf32> -> vector<32x128xf32>
    %c0_12 = arith.constant 0 : index
    %c0_13 = arith.constant 0 : index
    %c0_14 = arith.constant 0 : index
    %12 = vector.load %arg6[%c0_12, %c0_13, %c0_14] : memref<3x128x128xf32, #tpu.memory_space<vmem>>, vector<1x128x128xf32>
    %13 = vector.shape_cast %12 : vector<1x128x128xf32> to vector<128x128xf32>
    %cst_15 = arith.constant dense<0.000000e+00> : vector<32x128xf32>
    %14 = tpu.matmul %9, %13, %cst_15 {dimension_numbers = #tpu.dot_dimension_numbers<[1], [0], [0], [1], [0, 0, 1, 1], [], []>} : vector<32x128xf32>, vector<128x128xf32>, vector<32x128xf32> -> vector<32x128xf32>
    %c1 = arith.constant 1 : index
    %c0_16 = arith.constant 0 : index
    %c0_17 = arith.constant 0 : index
    %15 = vector.load %arg6[%c1, %c0_16, %c0_17] : memref<3x128x128xf32, #tpu.memory_space<vmem>>, vector<1x128x128xf32>
    %16 = vector.shape_cast %15 : vector<1x128x128xf32> to vector<128x128xf32>
    %cst_18 = arith.constant dense<0.000000e+00> : vector<32x128xf32>
    %17 = tpu.matmul %7, %16, %cst_18 {dimension_numbers = #tpu.dot_dimension_numbers<[1], [0], [0], [1], [0, 0, 1, 1], [], []>} : vector<32x128xf32>, vector<128x128xf32>, vector<32x128xf32> -> vector<32x128xf32>
    %18 = arith.addf %14, %17 : vector<32x128xf32>
    %c2 = arith.constant 2 : index
    %c0_19 = arith.constant 0 : index
    %c0_20 = arith.constant 0 : index
    %19 = vector.load %arg6[%c2, %c0_19, %c0_20] : memref<3x128x128xf32, #tpu.memory_space<vmem>>, vector<1x128x128xf32>
    %20 = vector.shape_cast %19 : vector<1x128x128xf32> to vector<128x128xf32>
    %cst_21 = arith.constant dense<0.000000e+00> : vector<32x128xf32>
    %21 = tpu.matmul %11, %20, %cst_21 {dimension_numbers = #tpu.dot_dimension_numbers<[1], [0], [0], [1], [0, 0, 1, 1], [], []>} : vector<32x128xf32>, vector<128x128xf32>, vector<32x128xf32> -> vector<32x128xf32>
    %22 = arith.addf %18, %21 : vector<32x128xf32>
    %c0_22 = arith.constant 0 : index
    %c0_23 = arith.constant 0 : index
    %23 = vector.load %arg7[%c0_22, %c0_23] : memref<1x128xf32, #tpu.memory_space<vmem>>, vector<1x128xf32>
    %24 = vector.broadcast %23 : vector<1x128xf32> to vector<32x128xf32>
    %25 = arith.addf %22, %24 : vector<32x128xf32>
    %cst_24 = arith.constant 0.000000e+00 : f32
    %26 = vector.broadcast %cst_24 : f32 to vector<32x128xf32>
    %27 = arith.maximumf %25, %26 : vector<32x128xf32>
    %c0_25 = arith.constant 0 : index
    %c0_26 = arith.constant 0 : index
    %28 = vector.load %arg8[%c0_25, %c0_26] : memref<128x512xf32, #tpu.memory_space<vmem>>, vector<128x512xf32>
    %cst_27 = arith.constant dense<0.000000e+00> : vector<32x512xf32>
    %29 = tpu.matmul %27, %28, %cst_27 {dimension_numbers = #tpu.dot_dimension_numbers<[1], [0], [0], [1], [0, 0, 1, 1], [], []>} : vector<32x128xf32>, vector<128x512xf32>, vector<32x512xf32> -> vector<32x512xf32>
    %c0_28 = arith.constant 0 : index
    %c0_29 = arith.constant 0 : index
    %30 = vector.load %arg9[%c0_28, %c0_29] : memref<128x512xf32, #tpu.memory_space<vmem>>, vector<128x512xf32>
    %cst_30 = arith.constant dense<0.000000e+00> : vector<32x512xf32>
    %31 = tpu.matmul %0, %30, %cst_30 {dimension_numbers = #tpu.dot_dimension_numbers<[1], [0], [0], [1], [0, 0, 1, 1], [], []>} : vector<32x128xf32>, vector<128x512xf32>, vector<32x512xf32> -> vector<32x512xf32>
    %32 = arith.addf %29, %31 : vector<32x512xf32>
    %c0_31 = arith.constant 0 : index
    %c0_32 = arith.constant 0 : index
    %33 = vector.load %arg10[%c0_31, %c0_32] : memref<1x512xf32, #tpu.memory_space<vmem>>, vector<1x512xf32>
    %34 = vector.broadcast %33 : vector<1x512xf32> to vector<32x512xf32>
    %35 = arith.addf %32, %34 : vector<32x512xf32>
    %cst_33 = arith.constant 0.000000e+00 : f32
    %36 = vector.broadcast %cst_33 : f32 to vector<32x512xf32>
    %37 = arith.maximumf %35, %36 : vector<32x512xf32>
    %c0_34 = arith.constant 0 : index
    %c0_35 = arith.constant 0 : index
    %38 = vector.load %arg11[%c0_34, %c0_35] : memref<32x512xf32, #tpu.memory_space<vmem>>, vector<32x512xf32>
    tpu.vector_store %arg11[%c0_34, %c0_35], %37 {strides = array<i32>} : memref<32x512xf32, #tpu.memory_space<vmem>>, vector<32x512xf32>,
    return
  }
  func.func @transform_0(%arg0: i32) -> (i32, i32) {
    %c0_i32 = arith.constant 0 : i32
    %c0_i32_0 = arith.constant 0 : i32
    %c0_i32_1 = arith.constant 0 : i32
    return %c0_i32, %c0_i32_0 : i32, i32
  }
  func.func @transform_1(%arg0: i32) -> (i32, i32) {
    %c0_i32 = arith.constant 0 : i32
    %c0_i32_0 = arith.constant 0 : i32
    %c0_i32_1 = arith.constant 0 : i32
    return %c0_i32, %c0_i32_0 : i32, i32
  }
  func.func @transform_2(%arg0: i32) -> (i32, i32) {
    %c0_i32 = arith.constant 0 : i32
    %c0_i32_0 = arith.constant 0 : i32
    %c0_i32_1 = arith.constant 0 : i32
    return %c0_i32, %c0_i32_0 : i32, i32
  }
  func.func @transform_3(%arg0: i32) -> (i32, i32) {
    %c0_i32 = arith.constant 0 : i32
    %c0_i32_0 = arith.constant 0 : i32
    %c0_i32_1 = arith.constant 0 : i32
    return %c0_i32, %c0_i32_0 : i32, i32
  }
  func.func @transform_4(%arg0: i32) -> (i32, i32) {
    %c0_i32 = arith.constant 0 : i32
    %c0_i32_0 = arith.constant 0 : i32
    %c0_i32_1 = arith.constant 0 : i32
    return %c0_i32, %c0_i32_0 : i32, i32
  }
  func.func @transform_5(%arg0: i32) -> (i32, i32, i32) {
    %c0_i32 = arith.constant 0 : i32
    %c0_i32_0 = arith.constant 0 : i32
    %c0_i32_1 = arith.constant 0 : i32
    %c0_i32_2 = arith.constant 0 : i32
    return %c0_i32, %c0_i32_0, %c0_i32_1 : i32, i32, i32
  }
  func.func @transform_6(%arg0: i32) -> (i32, i32) {
    %c0_i32 = arith.constant 0 : i32
    %c0_i32_0 = arith.constant 0 : i32
    %c0_i32_1 = arith.constant 0 : i32
    return %c0_i32, %c0_i32_0 : i32, i32
  }
  func.func @transform_7(%arg0: i32) -> (i32, i32) {
    %c0_i32 = arith.constant 0 : i32
    %c0_i32_0 = arith.constant 0 : i32
    %c0_i32_1 = arith.constant 0 : i32
    return %c0_i32, %c0_i32_0 : i32, i32
  }
  func.func @transform_8(%arg0: i32) -> (i32, i32) {
    %c0_i32 = arith.constant 0 : i32
    %c0_i32_0 = arith.constant 0 : i32
    %c0_i32_1 = arith.constant 0 : i32
    return %c0_i32, %c0_i32_0 : i32, i32
  }
  func.func @transform_9(%arg0: i32) -> (i32, i32) {
    %c0_i32 = arith.constant 0 : i32
    %c0_i32_0 = arith.constant 0 : i32
    %c0_i32_1 = arith.constant 0 : i32
    return %c0_i32, %c0_i32_0 : i32, i32
  }
  func.func @transform_10(%arg0: i32) -> (i32, i32) {
    %c0_i32 = arith.constant 0 : i32
    %c0_i32_0 = arith.constant 0 : i32
    %c0_i32_1 = arith.constant 0 : i32
    return %c0_i32, %c0_i32_0 : i32, i32
  }
}

</mosaic_0001>

<bundles_post_ra>
// kernel: tpu_custom_call.1
= control target key start
LH: loop header
LB: loop body
LE: loop exit
PB: predicated region body
PF: predicated region fallthrough
CT: control target
= control target key end

     0   :  { %15 = vsyncpa [#allocation3], 0  ;;  %s2043_s0 = inlined_call_operand.hbm [shape: f32[32,128], index: 0, kind: input, shape index: {}]   ;;  %s2044_s1 = inlined_call_operand.hbm [shape: f32[128,128], index: 1, kind: input, shape index: {}]   ;;  %s2045_s2 = inlined_call_operand.vmem [shape: f32[1,128], index: 2, kind: input, shape index: {}]   ;;  %s2046_s3 = inlined_call_operand.hbm [shape: f32[32,32], index: 3, kind: input, shape index: {}]   ;;  %s2047_s4 = inlined_call_operand.hbm [shape: f32[32,32], index: 4, kind: input, shape index: {}]   ;;  %s2048_s5 = inlined_call_operand.hbm [shape: f32[3,128,128], index: 5, kind: input, shape index: {}]   ;;  %s2049_s6 = inlined_call_operand.vmem [shape: f32[1,128], index: 6, kind: input, shape index: {}]   ;;  %s2050_s7 = inlined_call_operand.hbm [shape: f32[128,512], index: 7, kind: input, shape index: {}]   ;;  %s2051_s8 = inlined_call_operand.hbm [shape: f32[128,512], index: 8, kind: input, shape index: {}]   ;;  %s2052_s9 = inlined_call_operand.vmem [shape: f32[1,512], index: 9, kind: input, shape index: {}]   ;;  %s2053_s10 = inlined_call_operand.hbm [shape: f32[32,512], index: 10, kind: output, shape index: {}]  }
   0x1   :  { %16 = vsyncpa [#allocation6], 0 }
   0x2   :  { %17 = vsyncpa [#allocation9], 0 }
   0x3   :  { %18 = vsyncpa [#allocation12], 0 }
   0x4   :  { %19 = vsyncpa [#allocation4], 0  ;;  %s1817_s13 = smov [#allocation5]   ;;  %s1818_s15 = smov [#allocation8]  }
   0x5   :  { %s37_s14 = sshll.u32 %s1817_s13, 4  ;;  %s63_s16 = sshll.u32 %s1818_s15, 4  ;;  %s38_s14 = int_to_ptr.vmem [resolvable:$true] %s37_s14  ;;  %s64_s16 = int_to_ptr.vmem [resolvable:$true] %s63_s16 }
   0x6   :  { %s1655_s17 = scalar_lea.vmem %s38_s14, 2048  ;;  %p1660_p1 = scmp.lt.s32.totalorder %s38_s14, %s38_s14 }
   0x7   :  { %p1656_p0 = scmp.ne.s32.totalorder %s38_s14, %s1655_s17  ;;  %p1661_p2 = scmp.lt.s32.totalorder %s1655_s17, %s1655_s17 }
   0x9   :  { %p1662_p3 = por %p1661_p2, %p1660_p1 }
   0xb   :  { %p1663_p4 = pnand %p1662_p3, %p1656_p0 }
   0xd   :  { %1666 = shalt.err (!%p1663_p4)
}
   0xe   :  { %s1819_s18 = smov 128   ;;  %s1820_s19 = smov 8  }
   0xf   :  { %43 = dma.hbm_to_vmem [thread:$0]  %s2044_s1, 2048, %s38_s14, [#allocation6], %s1819_s18, %s1819_s18, %s1820_s19  }
  0x10   :  { %s1675_s22 = scalar_lea.vmem %s64_s16, 512  ;;  %p1680_p6 = scmp.lt.s32.totalorder %s64_s16, %s64_s16 }
  0x11   :  { %p1676_p5 = scmp.ne.s32.totalorder %s64_s16, %s1675_s22  ;;  %p1681_p7 = scmp.lt.s32.totalorder %s1675_s22, %s1675_s22 }
  0x13   :  { %p1682_p8 = por %p1681_p7, %p1680_p6 }
  0x15   :  { %p1683_p9 = pnand %p1682_p8, %p1676_p5 }
  0x17   :  { %1686 = shalt.err (!%p1683_p9)
}
  0x18   :  { %69 = dma.hbm_to_vmem [thread:$0]  %s2047_s4, 512, %s64_s16, [#allocation9], %s1819_s18, %s1819_s18, %s1820_s19  }
  0x19   :  { %s1821_s25 = smov [#allocation11]  }
  0x1a   :  { %s89_s26 = sshll.u32 %s1821_s25, 4  ;;  %s90_s26 = int_to_ptr.vmem [resolvable:$true] %s89_s26 }
  0x1b   :  { %s1695_s27 = scalar_lea.vmem %s90_s26, 8192  ;;  %p1700_p11 = scmp.lt.s32.totalorder %s90_s26, %s90_s26 }
  0x1c   :  { %p1696_p10 = scmp.ne.s32.totalorder %s90_s26, %s1695_s27  ;;  %p1701_p12 = scmp.lt.s32.totalorder %s1695_s27, %s1695_s27 }
  0x1e   :  { %p1702_p13 = por %p1701_p12, %p1700_p11 }
  0x20   :  { %p1703_p0 = pnand %p1702_p13, %p1696_p10 }
  0x22   :  { %1706 = shalt.err (!%p1703_p0)
}
  0x23   :  { %s1822_s1 = smov 512   ;;  %s1823_s28 = smov 32  }
  0x24   :  { %95 = dma.hbm_to_vmem [thread:$0]  %s2050_s7, 8192, %s90_s26, [#allocation12], %s1822_s1, %s1822_s1, %s1823_s28  }
  0x25   :  { %s1824_s4 = smov [#allocation2]   ;;  %s1825_s12 = smov [#allocation7]  }
  0x26   :  { %s25_s11 = sshll.u32 %s1824_s4, 4  ;;  %s51_s13 = sshll.u32 %s1825_s12, 4  ;;  %s26_s11 = int_to_ptr.vmem [resolvable:$true] %s25_s11  ;;  %s52_s13 = int_to_ptr.vmem [resolvable:$true] %s51_s13 }
  0x27   :  { %s1715_s14 = scalar_lea.vmem %s26_s11, 512  ;;  %p1720_p2 = scmp.lt.s32.totalorder %s26_s11, %s26_s11 }
  0x28   :  { %p1716_p1 = scmp.ne.s32.totalorder %s26_s11, %s1715_s14  ;;  %p1721_p3 = scmp.lt.s32.totalorder %s1715_s14, %s1715_s14 }
  0x2a   :  { %p1722_p4 = por %p1721_p3, %p1720_p2 }
  0x2c   :  { %p1723_p5 = pnand %p1722_p4, %p1716_p1 }
  0x2e   :  { %1726 = shalt.err (!%p1723_p5)
}
  0x2f   :  { %31 = dma.hbm_to_vmem [thread:$0]  %s2043_s0, 512, %s26_s11, [#allocation3], %s1819_s18, %s1819_s18, %s1820_s19  }
  0x30   :  { %s1735_s7 = scalar_lea.vmem %s52_s13, 512  ;;  %p1740_p7 = scmp.lt.s32.totalorder %s52_s13, %s52_s13 }
  0x31   :  { %p1736_p6 = scmp.ne.s32.totalorder %s52_s13, %s1735_s7  ;;  %p1741_p8 = scmp.lt.s32.totalorder %s1735_s7, %s1735_s7 }
  0x33   :  { %p1742_p9 = por %p1741_p8, %p1740_p7 }
  0x35   :  { %p1743_p10 = pnand %p1742_p9, %p1736_p6 }
  0x37   :  { %1746 = shalt.err (!%p1743_p10)
}
  0x38   :  { %57 = dma.hbm_to_vmem [thread:$0]  %s2046_s3, 512, %s52_s13, [#allocation6], %s1819_s18, %s1819_s18, %s1820_s19  }
  0x39   :  { %s1826_s21 = smov [#allocation10]   ;;  %s1827_s23 = smov [#allocation13]  }
  0x3a   :  { %s75_s22 = sshll.u32 %s1826_s21, 4  ;;  %s101_s0 = sshll.u32 %s1827_s23, 4  ;;  %s76_s22 = int_to_ptr.vmem [resolvable:$true] %s75_s22  ;;  %s102_s0 = int_to_ptr.vmem [resolvable:$true] %s101_s0 }
  0x3b   :  { %s1755_s24 = scalar_lea.vmem %s76_s22, 6144  ;;  %p1760_p12 = scmp.lt.s32.totalorder %s76_s22, %s76_s22 }
  0x3c   :  { %p1756_p11 = scmp.ne.s32.totalorder %s76_s22, %s1755_s24  ;;  %p1761_p13 = scmp.lt.s32.totalorder %s1755_s24, %s1755_s24 }
  0x3e   :  { %p1762_p0 = por %p1761_p13, %p1760_p12 }
  0x40   :  { %p1763_p1 = pnand %p1762_p0, %p1756_p11 }
  0x42   :  { %1766 = shalt.err (!%p1763_p1)
}
  0x43   :  { %81 = dma.hbm_to_vmem [thread:$0]  %s2048_s5, 6144, %s76_s22, [#allocation9], %s1819_s18, %s1819_s18, %s1820_s19  }
  0x44   :  { %s1775_s3 = scalar_lea.vmem %s102_s0, 8192  ;;  %p1780_p3 = scmp.lt.s32.totalorder %s102_s0, %s102_s0 }
  0x45   :  { %p1776_p2 = scmp.ne.s32.totalorder %s102_s0, %s1775_s3  ;;  %p1781_p4 = scmp.lt.s32.totalorder %s1775_s3, %s1775_s3 }
  0x47   :  { %p1782_p5 = por %p1781_p4, %p1780_p3 }
  0x49   :  { %p1783_p6 = pnand %p1782_p5, %p1776_p2 }
  0x4b   :  { %1786 = shalt.err (!%p1783_p6)
}
  0x4c   :  { %107 = dma.hbm_to_vmem [thread:$0]  %s2051_s8, 8192, %s102_s0, [#allocation12], %s1822_s1, %s1822_s1, %s1823_s28  }
  0x4d   :  { %1807 = dma.done.wait [#allocation3], 512  }
  0x4e   :  { %1808 = vsyncadd [#allocation3], 4294966784 }
  0x4f   :  { %1809 = dma.done.wait [#allocation6], 2560  }
  0x50   :  { %1810 = vsyncadd [#allocation6], 4294964736 }
  0x51   :  { %1811 = dma.done.wait [#allocation9], 6656  }
  0x52   :  { %1812 = vsyncadd [#allocation9], 4294960640 }
  0x53   :  { %1813 = dma.done.wait [#allocation12], 16384  }
  0x54   :  { %1814 = vsyncadd [#allocation12], 4294950912  ;;  %v150_v0 = vld [vmem:[#allocation5 + $0x78] sm:$0xff]  ;;  %v149_v1 = vld [vmem:[#allocation5 + $0x70] sm:$0xff]  ;;  %vm251_vm0 = vcmask 261120  }
  0x55   :  { %1454 = vmatprep.subr.mxu0 %v150_v0  ;;  %v148_v2 = vld [vmem:[#allocation5 + $0x68] sm:$0xff]  ;;  %v147_v3 = vld [vmem:[#allocation5 + $0x60] sm:$0xff]  ;;  %v146_v5 = vld [vmem:[#allocation5 + $0x58] sm:$0xff] }
  0x56   :  { %1455 = vmatpush3.msra.mxu0 %v150_v0  ;;  %v1927_v4 = vld [vmem:[#allocation2] sm:$0xff]  ;;  %v145_v6 = vld [vmem:[#allocation5 + $0x50] sm:$0xff]  ;;  %v144_v7 = vld [vmem:[#allocation5 + $0x48] sm:$0xff] }
  0x57   :  { %1456 = vmatprep.subr.mxu0 %v149_v1  ;;  %1486 = vmatprep.mubr.f32.mxu0 %v1927_v4  ;;  %v143_v8 = vld [vmem:[#allocation5 + $0x40] sm:$0xff]  ;;  %v142_v9 = vld [vmem:[#allocation5 + $0x38] sm:$0xff]  ;;  %v141_v10 = vld [vmem:[#allocation5 + $0x30] sm:$0xff] }
  0x58   :  { %1457 = vmatpush3.msra.mxu0 %v149_v1  ;;  %v140_v11 = vld [vmem:[#allocation5 + $0x28] sm:$0xff]  ;;  %v139_v12 = vld [vmem:[#allocation5 + $0x20] sm:$0xff]  ;;  %v138_v13 = vld [vmem:[#allocation5 + $0x18] sm:$0xff] }
  0x59   :  { %1458 = vmatprep.subr.mxu0 %v148_v2  ;;  %v137_v14 = vld [vmem:[#allocation5 + $0x10] sm:$0xff]  ;;  %v136_v15 = vld [vmem:[#allocation5 + $0x8] sm:$0xff]  ;;  %v135_v16 = vld [vmem:[#allocation5] sm:$0xff] }
  0x5a   :  { %1459 = vmatpush3.msra.mxu0 %v148_v2  ;;  %v1930_v17 = vld [vmem:[#allocation2 + $0x8] sm:$0xff]  ;;  %v1932_v18 = vld [vmem:[#allocation2 + $0x10] sm:$0xff]  ;;  %v1936_v19 = vld [vmem:[#allocation2 + $0x18] sm:$0xff] }
  0x5b   :  { %1460 = vmatprep.subr.mxu0 %v147_v3  ;;  %v247_v20 = vld [vmem:[#allocation7] sm:$0xff]  ;;  %v248_v35 = vld [vmem:[#allocation7 + $0x8] sm:$0xff]  ;;  %v482_v37 = vld [vmem:[#allocation10 + $0xf8] sm:$0xff] }
  0x5c   :  { %1461 = vmatpush3.msra.mxu0 %v147_v3  ;;  %v349_v21 = vld [vmem:[#allocation8] sm:$0xff]  ;;  %v350_v36 = vld [vmem:[#allocation8 + $0x8] sm:$0xff]  ;;  %v249_v38 = vld [vmem:[#allocation7 + $0x10] sm:$0xff] }
  0x5d   :  { %1462 = vmatprep.subr.mxu0 %v146_v5  ;;  %1514 = vmatprep.mubr.msk.f32.mxu1 %vm251_vm0, %v349_v21  ;;  %v1348_v24 = vld [vmem:[%s2045_s2] ss:$0 sm:$0xff]  ;;  %v351_v39 = vld [vmem:[#allocation8 + $0x10] sm:$0xff]  ;;  %v465_v41 = vld [vmem:[#allocation10 + $0x78] sm:$0xff] }
  0x5e   :  { %1463 = vmatpush3.msra.mxu0 %v146_v5  ;;  %v481_v40 = vld [vmem:[#allocation10 + $0xf0] sm:$0xff]  ;;  %v250_v42 = vld [vmem:[#allocation7 + $0x18] sm:$0xff]  ;;  %v480_v44 = vld [vmem:[#allocation10 + $0xe8] sm:$0xff] }
  0x5f   :  { %1464 = vmatprep.subr.mxu0 %v145_v6  ;;  %v352_v43 = vld [vmem:[#allocation8 + $0x18] sm:$0xff]  ;;  %v479_v45 = vld [vmem:[#allocation10 + $0xe0] sm:$0xff]  ;;  %v464_v46 = vld [vmem:[#allocation10 + $0x70] sm:$0xff] }
  0x60   :  { %1465 = vmatpush3.msra.mxu0 %v145_v6  ;;  %v478_v47 = vld [vmem:[#allocation10 + $0xd8] sm:$0xff]  ;;  %v463_v48 = vld [vmem:[#allocation10 + $0x68] sm:$0xff]  ;;  %v477_v49 = vld [vmem:[#allocation10 + $0xd0] sm:$0xff] }
  0x61   :  { %1466 = vmatprep.subr.mxu0 %v144_v7  ;;  %v462_v50 = vld [vmem:[#allocation10 + $0x60] sm:$0xff]  ;;  %v476_v51 = vld [vmem:[#allocation10 + $0xc8] sm:$0xff]  ;;  %v461_v52 = vld [vmem:[#allocation10 + $0x58] sm:$0xff] }
  0x62   :  { %1467 = vmatpush3.msra.mxu0 %v144_v7  ;;  %v475_v53 = vld [vmem:[#allocation10 + $0xc0] sm:$0xff]  ;;  %v460_v54 = vld [vmem:[#allocation10 + $0x50] sm:$0xff]  ;;  %v474_v55 = vld [vmem:[#allocation10 + $0xb8] sm:$0xff] }
  0x63   :  { %1468 = vmatprep.subr.mxu0 %v143_v8  ;;  %v459_v56 = vld [vmem:[#allocation10 + $0x48] sm:$0xff]  ;;  %v473_v57 = vld [vmem:[#allocation10 + $0xb0] sm:$0xff]  ;;  %v458_v58 = vld [vmem:[#allocation10 + $0x40] sm:$0xff] }
  0x64   :  { %1469 = vmatpush3.msra.mxu0 %v143_v8  ;;  %v472_v59 = vld [vmem:[#allocation10 + $0xa8] sm:$0xff]  ;;  %v457_v60 = vld [vmem:[#allocation10 + $0x38] sm:$0xff]  ;;  %v471_v61 = vld [vmem:[#allocation10 + $0xa0] sm:$0xff] }
  0x65   :  { %1470 = vmatprep.subr.mxu0 %v142_v9  ;;  %v456_v62 = vld [vmem:[#allocation10 + $0x30] sm:$0xff]  ;;  %v470_v63 = vld [vmem:[#allocation10 + $0x98] sm:$0xff]  ;;  %v455_v0 = vld [vmem:[#allocation10 + $0x28] sm:$0xff] }
  0x66   :  { %1471 = vmatpush3.msra.mxu0 %v142_v9  ;;  %v469_v1 = vld [vmem:[#allocation10 + $0x90] sm:$0xff]  ;;  %v454_v2 = vld [vmem:[#allocation10 + $0x20] sm:$0xff]  ;;  %v468_v3 = vld [vmem:[#allocation10 + $0x88] sm:$0xff] }
  0x67   :  { %1472 = vmatprep.subr.mxu0 %v141_v10  ;;  %v453_v5 = vld [vmem:[#allocation10 + $0x18] sm:$0xff]  ;;  %v467_v6 = vld [vmem:[#allocation10 + $0x80] sm:$0xff]  ;;  %v452_v7 = vld [vmem:[#allocation10 + $0x10] sm:$0xff] }
  0x68   :  { %1473 = vmatpush3.msra.mxu0 %v141_v10  ;;  %v669_v8 = vld [vmem:[#allocation10 + $0x178] sm:$0xff]  ;;  %v668_v9 = vld [vmem:[#allocation10 + $0x170] sm:$0xff]  ;;  %v667_v10 = vld [vmem:[#allocation10 + $0x168] sm:$0xff] }
  0x69   :  { %1474 = vmatprep.subr.mxu0 %v140_v11  ;;  %v659_v21 = vld [vmem:[#allocation10 + $0x128] sm:$0xff] }
  0x6a   :  { %1475 = vmatpush3.msra.mxu0 %v140_v11  ;;  %v666_v11 = vld [vmem:[#allocation10 + $0x160] sm:$0xff] }
  0x6b   :  { %1476 = vmatprep.subr.mxu0 %v139_v12 }
  0x6c   :  { %1477 = vmatpush3.msra.mxu0 %v139_v12  ;;  %v665_v12 = vld [vmem:[#allocation10 + $0x158] sm:$0xff] }
  0x6d   :  { %1478 = vmatprep.subr.mxu0 %v138_v13 }
  0x6e   :  { %1479 = vmatpush3.msra.mxu0 %v138_v13  ;;  %v664_v13 = vld [vmem:[#allocation10 + $0x150] sm:$0xff] }
  0x6f   :  { %1480 = vmatprep.subr.mxu0 %v137_v14 }
  0x70   :  { %1481 = vmatpush3.msra.mxu0 %v137_v14  ;;  %v663_v14 = vld [vmem:[#allocation10 + $0x148] sm:$0xff] }
  0x71   :  { %1482 = vmatprep.subr.mxu0 %v136_v15 }
  0x72   :  { %1483 = vmatpush3.msra.mxu0 %v136_v15  ;;  %v662_v15 = vld [vmem:[#allocation10 + $0x140] sm:$0xff] }
  0x73   :  { %1484 = vmatprep.subr.mxu0 %v135_v16 }
  0x74   :  { %1485 = vmatpush3.msra.mxu0 %v135_v16  ;;  %v661_v16 = vld [vmem:[#allocation10 + $0x138] sm:$0xff] }
  0x75   :  { %1487 = vmatmul.mubr.f32.vlgmr.msra.gmra.mxu0 %v1930_v17 }
  0x76   :  { %1489 = vmatprep.mubr.f32.mxu0 %v1932_v18 }
  0x79   :  { %1490 = vmatmul.mubr.f32.gmra.mxu0 %v1936_v19 }
  0x7a   :  { %1500 = vmatprep.mubr.msk.f32.mxu0 %vm251_vm0, %v247_v20  ;;  %v660_v20 = vld [vmem:[#allocation10 + $0x130] sm:$0xff] }
 0x135   :  { %v1488_v22 = vpop.f32.mrf.mxu0 }
 0x136   :  { %v230_v28 = vadd.f32 %v1488_v22, %v1348_v24  ;;  %v658_v22 = vld [vmem:[#allocation10 + $0x120] sm:$0xff] }
 0x137   :  { %v224_v23 = vpop.f32.mrf.mxu0 }
 0x138   :  { %v225_v31 = vadd.f32 %v1348_v24, %v224_v23  ;;  %v1952_v33 = vmax.f32 %v230_v28, 0.0  ;;  %v657_v23 = vld [vmem:[#allocation10 + $0x118] sm:$0xff]  ;;  %v654_v28 = vld [vmem:[#allocation10 + $0x100] sm:$0xff] }
 0x139   :  { %v1491_v25 = vpop.f32.mrf.mxu0 }
 0x13a   :  { %v240_v26 = vadd.f32 %v1491_v25, %v1348_v24  ;;  %v243_v34 = vmax.f32 %v225_v31, 0.0  ;;  %v451_v25 = vld [vmem:[#allocation10 + $0x8] sm:$0xff] }
 0x13b   :  { %v234_v27 = vpop.f32.mrf.mxu0 }
 0x13c   :  { %v1944_v29 = vmax.f32 %v240_v26, 0.0  ;;  %v235_v30 = vadd.f32 %v1348_v24, %v234_v27  ;;  %v656_v24 = vld [vmem:[#allocation10 + $0x110] sm:$0xff]  ;;  %v655_v26 = vld [vmem:[#allocation10 + $0x108] sm:$0xff]  ;;  %v450_v27 = vld [vmem:[#allocation10] sm:$0xff] }
 0x13e   :  { %v1946_v32 = vmax.f32 %v235_v30, 0.0  ;;  %1492 = vmatprep.subr.mxu0 %v1944_v29  ;;  %1506 = vmatprep.subr.mxu1 %v1944_v29  ;;  %v901_v30 = vld [vmem:[#allocation13 + $0x1f8] sm:$0xff] }
 0x13f   :  { %1493 = vmatpush3.msra.mxu0 %v1944_v29  ;;  %1507 = vmatpush3.msra.mxu1 %v1944_v29 }
 0x140   :  { %1494 = vmatprep.subr.mxu0 %v1946_v32  ;;  %1508 = vmatprep.subr.mxu1 %v1946_v32 }
 0x141   :  { %1495 = vmatpush3.msra.mxu0 %v1946_v32  ;;  %1509 = vmatpush3.msra.mxu1 %v1946_v32 }
 0x142   :  { %1496 = vmatprep.subr.mxu0 %v1952_v33  ;;  %1510 = vmatprep.subr.mxu1 %v1952_v33 }
 0x143   :  { %1497 = vmatpush3.msra.mxu0 %v1952_v33  ;;  %1511 = vmatpush3.msra.mxu1 %v1952_v33 }
 0x144   :  { %1498 = vmatprep.subr.mxu0 %v243_v34  ;;  %1512 = vmatprep.subr.mxu1 %v243_v34 }
 0x145   :  { %1499 = vmatpush3.msra.mxu0 %v243_v34  ;;  %1513 = vmatpush3.msra.mxu1 %v243_v34 }
 0x146   :  { %1501 = vmatmul.mubr.msk.f32.vlgmr.msra.gmra.mxu0 %vm251_vm0, %v248_v35  ;;  %1515 = vmatmul.mubr.msk.f32.vlgmr.msra.gmra.mxu1 %vm251_vm0, %v350_v36  ;;  %v898_v35 = vld [vmem:[#allocation13 + $0x1e0] sm:$0xff]  ;;  %v900_v36 = vld [vmem:[#allocation13 + $0x1f0] sm:$0xff] }
 0x147   :  { %1520 = vmatprep.subr.mxu1 %v482_v37  ;;  %1503 = vmatprep.mubr.msk.f32.mxu0 %vm251_vm0, %v249_v38  ;;  %v897_v38 = vld [vmem:[#allocation13 + $0x1d8] sm:$0xff] }
 0x148   :  { %1521 = vmatpush3.msra.mxu1 %v482_v37  ;;  %1517 = vmatprep.mubr.msk.f32.mxu1 %vm251_vm0, %v351_v39  ;;  %v895_v37 = vld [vmem:[#allocation13 + $0x1c8] sm:$0xff] }
 0x149   :  { %1522 = vmatprep.subr.mxu1 %v481_v40  ;;  %1558 = vmatprep.subr.mxu0 %v465_v41 }
 0x14a   :  { %1523 = vmatpush3.msra.mxu1 %v481_v40  ;;  %1504 = vmatmul.mubr.msk.f32.gmra.mxu0 %vm251_vm0, %v250_v42  ;;  %v894_v40 = vld [vmem:[#allocation13 + $0x1c0] sm:$0xff] }
 0x14b   :  { %1518 = vmatmul.mubr.msk.f32.gmra.mxu1 %vm251_vm0, %v352_v43  ;;  %1524 = vmatprep.subr.mxu1 %v480_v44  ;;  %v891_v43 = vld [vmem:[#allocation13 + $0x1a8] sm:$0xff] }
 0x14c   :  { %1525 = vmatpush3.msra.mxu1 %v480_v44  ;;  %1552 = vmatprep.mubr.f32.mxu1 %v243_v34 }
 0x14d   :  { %1526 = vmatprep.subr.mxu1 %v479_v45  ;;  %1559 = vmatpush3.msra.mxu0 %v465_v41 }
 0x14e   :  { %1527 = vmatpush3.msra.mxu1 %v479_v45  ;;  %1560 = vmatprep.subr.mxu0 %v464_v46  ;;  %v896_v45 = vld [vmem:[#allocation13 + $0x1d0] sm:$0xff] }
 0x14f   :  { %1528 = vmatprep.subr.mxu1 %v478_v47  ;;  %1561 = vmatpush3.msra.mxu0 %v464_v46  ;;  %v890_v46 = vld [vmem:[#allocation13 + $0x1a0] sm:$0xff] }
 0x150   :  { %1529 = vmatpush3.msra.mxu1 %v478_v47  ;;  %1562 = vmatprep.subr.mxu0 %v463_v48  ;;  %v893_v47 = vld [vmem:[#allocation13 + $0x1b8] sm:$0xff] }
 0x151   :  { %1530 = vmatprep.subr.mxu1 %v477_v49  ;;  %1563 = vmatpush3.msra.mxu0 %v463_v48  ;;  %v887_v48 = vld [vmem:[#allocation13 + $0x188] sm:$0xff] }
 0x152   :  { %1531 = vmatpush3.msra.mxu1 %v477_v49  ;;  %1564 = vmatprep.subr.mxu0 %v462_v50  ;;  %v892_v49 = vld [vmem:[#allocation13 + $0x1b0] sm:$0xff] }
 0x153   :  { %1532 = vmatprep.subr.mxu1 %v476_v51  ;;  %1565 = vmatpush3.msra.mxu0 %v462_v50  ;;  %v886_v50 = vld [vmem:[#allocation13 + $0x180] sm:$0xff] }
 0x154   :  { %1533 = vmatpush3.msra.mxu1 %v476_v51  ;;  %1566 = vmatprep.subr.mxu0 %v461_v52  ;;  %v889_v51 = vld [vmem:[#allocation13 + $0x198] sm:$0xff] }
 0x155   :  { %1534 = vmatprep.subr.mxu1 %v475_v53  ;;  %1567 = vmatpush3.msra.mxu0 %v461_v52  ;;  %v883_v52 = vld [vmem:[#allocation13 + $0x168] sm:$0xff] }
 0x156   :  { %1535 = vmatpush3.msra.mxu1 %v475_v53  ;;  %1568 = vmatprep.subr.mxu0 %v460_v54  ;;  %v888_v53 = vld [vmem:[#allocation13 + $0x190] sm:$0xff] }
 0x157   :  { %1536 = vmatprep.subr.mxu1 %v474_v55  ;;  %1569 = vmatpush3.msra.mxu0 %v460_v54  ;;  %v882_v54 = vld [vmem:[#allocation13 + $0x160] sm:$0xff] }
 0x158   :  { %1537 = vmatpush3.msra.mxu1 %v474_v55  ;;  %1570 = vmatprep.subr.mxu0 %v459_v56  ;;  %v885_v55 = vld [vmem:[#allocation13 + $0x178] sm:$0xff] }
 0x159   :  { %1538 = vmatprep.subr.mxu1 %v473_v57  ;;  %1571 = vmatpush3.msra.mxu0 %v459_v56  ;;  %v879_v56 = vld [vmem:[#allocation13 + $0x148] sm:$0xff] }
 0x15a   :  { %1539 = vmatpush3.msra.mxu1 %v473_v57  ;;  %1572 = vmatprep.subr.mxu0 %v458_v58  ;;  %v884_v57 = vld [vmem:[#allocation13 + $0x170] sm:$0xff] }
 0x15b   :  { %1540 = vmatprep.subr.mxu1 %v472_v59  ;;  %1573 = vmatpush3.msra.mxu0 %v458_v58  ;;  %v878_v58 = vld [vmem:[#allocation13 + $0x140] sm:$0xff] }
 0x15c   :  { %1541 = vmatpush3.msra.mxu1 %v472_v59  ;;  %1574 = vmatprep.subr.mxu0 %v457_v60  ;;  %v881_v59 = vld [vmem:[#allocation13 + $0x158] sm:$0xff] }
 0x15d   :  { %1542 = vmatprep.subr.mxu1 %v471_v61  ;;  %1575 = vmatpush3.msra.mxu0 %v457_v60  ;;  %v875_v60 = vld [vmem:[#allocation13 + $0x128] sm:$0xff] }
 0x15e   :  { %1543 = vmatpush3.msra.mxu1 %v471_v61  ;;  %1576 = vmatprep.subr.mxu0 %v456_v62  ;;  %v880_v61 = vld [vmem:[#allocation13 + $0x150] sm:$0xff] }
 0x15f   :  { %1544 = vmatprep.subr.mxu1 %v470_v63  ;;  %1577 = vmatpush3.msra.mxu0 %v456_v62  ;;  %v874_v62 = vld [vmem:[#allocation13 + $0x120] sm:$0xff] }
 0x160   :  { %1545 = vmatpush3.msra.mxu1 %v470_v63  ;;  %1578 = vmatprep.subr.mxu0 %v455_v0  ;;  %v877_v63 = vld [vmem:[#allocation13 + $0x138] sm:$0xff] }
 0x161   :  { %1546 = vmatprep.subr.mxu1 %v469_v1  ;;  %1579 = vmatpush3.msra.mxu0 %v455_v0  ;;  %v871_v0 = vld [vmem:[#allocation13 + $0x108] sm:$0xff] }
 0x162   :  { %1547 = vmatpush3.msra.mxu1 %v469_v1  ;;  %1580 = vmatprep.subr.mxu0 %v454_v2  ;;  %v876_v1 = vld [vmem:[#allocation13 + $0x130] sm:$0xff] }
 0x163   :  { %1548 = vmatprep.subr.mxu1 %v468_v3  ;;  %1581 = vmatpush3.msra.mxu0 %v454_v2  ;;  %v870_v2 = vld [vmem:[#allocation13 + $0x100] sm:$0xff] }
 0x164   :  { %1549 = vmatpush3.msra.mxu1 %v468_v3  ;;  %1582 = vmatprep.subr.mxu0 %v453_v5  ;;  %v873_v3 = vld [vmem:[#allocation13 + $0x118] sm:$0xff] }
 0x165   :  { %1550 = vmatprep.subr.mxu1 %v467_v6  ;;  %1583 = vmatpush3.msra.mxu0 %v453_v5  ;;  %v867_v5 = vld [vmem:[#allocation13 + $0xe8] sm:$0xff] }
 0x166   :  { %1551 = vmatpush3.msra.mxu1 %v467_v6  ;;  %1584 = vmatprep.subr.mxu0 %v452_v7  ;;  %v872_v6 = vld [vmem:[#allocation13 + $0x110] sm:$0xff] }
 0x167   :  { %1553 = vmatmul.mubr.f32.vlgmr.msra.gmra.mxu1 %v1952_v33  ;;  %1596 = vmatprep.subr.mxu1 %v669_v8 }
 0x168   :  { %1555 = vmatprep.mubr.f32.mxu1 %v1946_v32  ;;  %1597 = vmatpush3.msra.mxu1 %v669_v8  ;;  %v869_v8 = vld [vmem:[#allocation13 + $0xf8] sm:$0xff] }
 0x169   :  { %1598 = vmatprep.subr.mxu1 %v668_v9  ;;  %1585 = vmatpush3.msra.mxu0 %v452_v7  ;;  %v866_v7 = vld [vmem:[#allocation13 + $0xe0] sm:$0xff] }
 0x16a   :  { %1599 = vmatpush3.msra.mxu1 %v668_v9  ;;  %1586 = vmatprep.subr.mxu0 %v451_v25  ;;  %v863_v9 = vld [vmem:[#allocation13 + $0xc8] sm:$0xff] }
 0x16b   :  { %1556 = vmatmul.mubr.f32.gmra.mxu1 %v1944_v29  ;;  %1600 = vmatprep.subr.mxu1 %v667_v10  ;;  %v899_v29 = vld [vmem:[#allocation13 + $0x1e8] sm:$0xff] }
 0x16c   :  { %1601 = vmatpush3.msra.mxu1 %v667_v10  ;;  %1587 = vmatpush3.msra.mxu0 %v451_v25  ;;  %v868_v10 = vld [vmem:[#allocation13 + $0xf0] sm:$0xff] }
 0x16d   :  { %1602 = vmatprep.subr.mxu1 %v666_v11  ;;  %1588 = vmatprep.subr.mxu0 %v450_v27  ;;  %v856_v25 = vld [vmem:[#allocation13 + $0x90] sm:$0xff] }
 0x16e   :  { %1603 = vmatpush3.msra.mxu1 %v666_v11  ;;  %1589 = vmatpush3.msra.mxu0 %v450_v27  ;;  %v862_v11 = vld [vmem:[#allocation13 + $0xc0] sm:$0xff]  ;;  %v853_v27 = vld [vmem:[#allocation13 + $0x78] sm:$0xff] }
 0x16f   :  { %1604 = vmatprep.subr.mxu1 %v665_v12  ;;  %902 = vmatprep.subr.mxu0 %v899_v29  ;;  %v852_v29 = vld [vmem:[#allocation13 + $0x70] sm:$0xff] }
 0x170   :  { %1605 = vmatpush3.msra.mxu1 %v665_v12  ;;  %v865_v12 = vld [vmem:[#allocation13 + $0xd8] sm:$0xff] }
 0x171   :  { %1606 = vmatprep.subr.mxu1 %v664_v13 }
 0x172   :  { %1607 = vmatpush3.msra.mxu1 %v664_v13  ;;  %v859_v13 = vld [vmem:[#allocation13 + $0xa8] sm:$0xff] }
 0x173   :  { %1608 = vmatprep.subr.mxu1 %v663_v14 }
 0x174   :  { %1609 = vmatpush3.msra.mxu1 %v663_v14  ;;  %v864_v14 = vld [vmem:[#allocation13 + $0xd0] sm:$0xff] }
 0x175   :  { %1610 = vmatprep.subr.mxu1 %v662_v15 }
 0x176   :  { %1611 = vmatpush3.msra.mxu1 %v662_v15  ;;  %v858_v15 = vld [vmem:[#allocation13 + $0xa0] sm:$0xff] }
 0x177   :  { %1612 = vmatprep.subr.mxu1 %v661_v16 }
 0x178   :  { %1613 = vmatpush3.msra.mxu1 %v661_v16  ;;  %v861_v16 = vld [vmem:[#allocation13 + $0xb8] sm:$0xff] }
 0x179   :  { %1614 = vmatprep.subr.mxu1 %v660_v20 }
 0x17a   :  { %1615 = vmatpush3.msra.mxu1 %v660_v20  ;;  %v855_v20 = vld [vmem:[#allocation13 + $0x88] sm:$0xff] }
 0x17b   :  { %1616 = vmatprep.subr.mxu1 %v659_v21 }
 0x17c   :  { %1617 = vmatpush3.msra.mxu1 %v659_v21  ;;  %v860_v21 = vld [vmem:[#allocation13 + $0xb0] sm:$0xff] }
 0x17d   :  { %1618 = vmatprep.subr.mxu1 %v658_v22 }
 0x17e   :  { %1619 = vmatpush3.msra.mxu1 %v658_v22  ;;  %v854_v22 = vld [vmem:[#allocation13 + $0x80] sm:$0xff] }
 0x17f   :  { %1620 = vmatprep.subr.mxu1 %v657_v23 }
 0x180   :  { %1621 = vmatpush3.msra.mxu1 %v657_v23  ;;  %v857_v23 = vld [vmem:[#allocation13 + $0x98] sm:$0xff] }
 0x181   :  { %1622 = vmatprep.subr.mxu1 %v656_v24 }
 0x182   :  { %1623 = vmatpush3.msra.mxu1 %v656_v24  ;;  %v851_v24 = vld [vmem:[#allocation13 + $0x68] sm:$0xff] }
 0x183   :  { %1624 = vmatprep.subr.mxu1 %v655_v26 }
 0x184   :  { %1625 = vmatpush3.msra.mxu1 %v655_v26  ;;  %v850_v26 = vld [vmem:[#allocation13 + $0x60] sm:$0xff] }
 0x185   :  { %1626 = vmatprep.subr.mxu1 %v654_v28 }
 0x186   :  { %1627 = vmatpush3.msra.mxu1 %v654_v28  ;;  %v847_v28 = vld [vmem:[#allocation13 + $0x48] sm:$0xff] }
 0x187   :  { %991 = vmatprep.subr.mxu1 %v901_v30  ;;  %v846_v30 = vld [vmem:[#allocation13 + $0x40] sm:$0xff] }
 0x206   :  { %v1502_v31 = vpop.f32.mrf.mxu0  ;;  %v1516_v32 = vpop.f32.mrf.mxu1 }
 0x208   :  { %v330_v33 = vpop.f32.mrf.mxu0  ;;  %v431_v34 = vpop.f32.mrf.mxu1 }
 0x209   :  { %1590 = vmatprep.mubr.f32.mxu0 %v330_v33  ;;  %1628 = vmatprep.mubr.f32.mxu1 %v431_v34  ;;  %v848_v33 = vld [vmem:[#allocation13 + $0x50] sm:$0xff]  ;;  %v842_v34 = vld [vmem:[#allocation13 + $0x20] sm:$0xff] }
 0x20a   :  { %v1505_v39 = vpop.f32.mrf.mxu0  ;;  %1591 = vmatmul.mubr.f32.vlgmr.msra.gmra.mxu0 %v1502_v31  ;;  %1629 = vmatmul.mubr.f32.vlgmr.msra.gmra.mxu1 %v1516_v32  ;;  %v849_v31 = vld [vmem:[#allocation13 + $0x58] sm:$0xff]  ;;  %v843_v32 = vld [vmem:[#allocation13 + $0x28] sm:$0xff] }
 0x20b   :  { %v1519_v41 = vpop.f32.mrf.mxu1  ;;  %903 = vmatpush1.msra.mxu0 %v898_v35  ;;  %992 = vmatpush1.msra.mxu1 %v900_v36  ;;  %v845_v35 = vld [vmem:[#allocation13 + $0x38] sm:$0xff]  ;;  %v839_v36 = vld [vmem:[#allocation13 + $0x8] sm:$0xff] }
 0x20c   :  { %v340_v42 = vpop.f32.mrf.mxu0  ;;  %904 = vmatprep.subr.mxu0 %v895_v37  ;;  %993 = vmatprep.subr.mxu1 %v897_v38  ;;  %v844_v37 = vld [vmem:[#allocation13 + $0x30] sm:$0xff]  ;;  %v838_v38 = vld [vmem:[#allocation13] sm:$0xff] }
 0x20d   :  { %1593 = vmatprep.mubr.f32.mxu0 %v340_v42  ;;  %v441_v44 = vpop.f32.mrf.mxu1  ;;  %905 = vmatpush1.msra.mxu0 %v894_v40  ;;  %v840_v40 = vld [vmem:[#allocation13 + $0x10] sm:$0xff]  ;;  %v835_v42 = vld [vmem:[#allocation11 + $0x1e8] sm:$0xff] }
 0x20e   :  { %1594 = vmatmul.mubr.f32.gmra.mxu0 %v1505_v39  ;;  %1631 = vmatprep.mubr.f32.mxu1 %v441_v44  ;;  %v841_v39 = vld [vmem:[#allocation13 + $0x18] sm:$0xff]  ;;  %v834_v44 = vld [vmem:[#allocation11 + $0x1e0] sm:$0xff] }
 0x20f   :  { %1632 = vmatmul.mubr.f32.gmra.mxu1 %v1519_v41  ;;  %906 = vmatprep.subr.mxu0 %v891_v43  ;;  %v1828_v41 = vmov 0.0   ;;  %v837_v43 = vld [vmem:[#allocation11 + $0x1f8] sm:$0xff] }
 0x210   :  { %994 = vmatpush1.msra.mxu1 %v896_v45  ;;  %907 = vmatpush1.msra.mxu0 %v890_v46  ;;  %v836_v45 = vld [vmem:[#allocation11 + $0x1f0] sm:$0xff]  ;;  %v831_v46 = vld [vmem:[#allocation11 + $0x1c8] sm:$0xff] }
 0x211   :  { %995 = vmatprep.subr.mxu1 %v893_v47  ;;  %908 = vmatprep.subr.mxu0 %v887_v48  ;;  %v833_v47 = vld [vmem:[#allocation11 + $0x1d8] sm:$0xff]  ;;  %v830_v48 = vld [vmem:[#allocation11 + $0x1c0] sm:$0xff] }
 0x212   :  { %996 = vmatpush1.msra.mxu1 %v892_v49  ;;  %909 = vmatpush1.msra.mxu0 %v886_v50  ;;  %v832_v49 = vld [vmem:[#allocation11 + $0x1d0] sm:$0xff]  ;;  %v827_v50 = vld [vmem:[#allocation11 + $0x1a8] sm:$0xff] }
 0x213   :  { %997 = vmatprep.subr.mxu1 %v889_v51  ;;  %910 = vmatprep.subr.mxu0 %v883_v52  ;;  %v829_v51 = vld [vmem:[#allocation11 + $0x1b8] sm:$0xff]  ;;  %v826_v52 = vld [vmem:[#allocation11 + $0x1a0] sm:$0xff] }
 0x214   :  { %998 = vmatpush1.msra.mxu1 %v888_v53  ;;  %911 = vmatpush1.msra.mxu0 %v882_v54  ;;  %v828_v53 = vld [vmem:[#allocation11 + $0x1b0] sm:$0xff]  ;;  %v823_v54 = vld [vmem:[#allocation11 + $0x188] sm:$0xff] }
 0x215   :  { %999 = vmatprep.subr.mxu1 %v885_v55  ;;  %912 = vmatprep.subr.mxu0 %v879_v56  ;;  %v825_v55 = vld [vmem:[#allocation11 + $0x198] sm:$0xff]  ;;  %v824_v56 = vld [vmem:[#allocation11 + $0x190] sm:$0xff] }
 0x216   :  { %1000 = vmatpush1.msra.mxu1 %v884_v57  ;;  %913 = vmatpush1.msra.mxu0 %v878_v58  ;;  %v819_v57 = vld [vmem:[#allocation11 + $0x168] sm:$0xff]  ;;  %v821_v58 = vld [vmem:[#allocation11 + $0x178] sm:$0xff] }
 0x217   :  { %1001 = vmatprep.subr.mxu1 %v881_v59  ;;  %914 = vmatprep.subr.mxu0 %v875_v60  ;;  %v818_v59 = vld [vmem:[#allocation11 + $0x160] sm:$0xff]  ;;  %v820_v60 = vld [vmem:[#allocation11 + $0x170] sm:$0xff] }
 0x218   :  { %1002 = vmatpush1.msra.mxu1 %v880_v61  ;;  %915 = vmatpush1.msra.mxu0 %v874_v62  ;;  %v815_v61 = vld [vmem:[#allocation11 + $0x148] sm:$0xff]  ;;  %v817_v62 = vld [vmem:[#allocation11 + $0x158] sm:$0xff] }
 0x219   :  { %1003 = vmatprep.subr.mxu1 %v877_v63  ;;  %916 = vmatprep.subr.mxu0 %v871_v0  ;;  %v814_v63 = vld [vmem:[#allocation11 + $0x140] sm:$0xff]  ;;  %v816_v0 = vld [vmem:[#allocation11 + $0x150] sm:$0xff] }
 0x21a   :  { %1004 = vmatpush1.msra.mxu1 %v876_v1  ;;  %917 = vmatpush1.msra.mxu0 %v870_v2  ;;  %v811_v1 = vld [vmem:[#allocation11 + $0x128] sm:$0xff]  ;;  %v813_v2 = vld [vmem:[#allocation11 + $0x138] sm:$0xff] }
 0x21b   :  { %1005 = vmatprep.subr.mxu1 %v873_v3  ;;  %918 = vmatprep.subr.mxu0 %v867_v5  ;;  %v810_v3 = vld [vmem:[#allocation11 + $0x120] sm:$0xff]  ;;  %v812_v5 = vld [vmem:[#allocation11 + $0x130] sm:$0xff] }
 0x21c   :  { %1006 = vmatpush1.msra.mxu1 %v872_v6  ;;  %919 = vmatpush1.msra.mxu0 %v866_v7  ;;  %v807_v6 = vld [vmem:[#allocation11 + $0x108] sm:$0xff]  ;;  %v809_v7 = vld [vmem:[#allocation11 + $0x118] sm:$0xff] }
 0x21d   :  { %1007 = vmatprep.subr.mxu1 %v869_v8  ;;  %920 = vmatprep.subr.mxu0 %v863_v9  ;;  %v806_v8 = vld [vmem:[#allocation11 + $0x100] sm:$0xff]  ;;  %v808_v9 = vld [vmem:[#allocation11 + $0x110] sm:$0xff] }
 0x21e   :  { %1008 = vmatpush1.msra.mxu1 %v868_v10  ;;  %921 = vmatpush1.msra.mxu0 %v862_v11  ;;  %v803_v10 = vld [vmem:[#allocation11 + $0xe8] sm:$0xff]  ;;  %v805_v11 = vld [vmem:[#allocation11 + $0xf8] sm:$0xff] }
 0x21f   :  { %1009 = vmatprep.subr.mxu1 %v865_v12  ;;  %922 = vmatprep.subr.mxu0 %v859_v13  ;;  %v802_v12 = vld [vmem:[#allocation11 + $0xe0] sm:$0xff]  ;;  %v804_v13 = vld [vmem:[#allocation11 + $0xf0] sm:$0xff] }
 0x220   :  { %1010 = vmatpush1.msra.mxu1 %v864_v14  ;;  %923 = vmatpush1.msra.mxu0 %v858_v15  ;;  %v799_v14 = vld [vmem:[#allocation11 + $0xc8] sm:$0xff]  ;;  %v801_v15 = vld [vmem:[#allocation11 + $0xd8] sm:$0xff] }
 0x221   :  { %1011 = vmatprep.subr.mxu1 %v861_v16  ;;  %924 = vmatprep.subr.mxu0 %v855_v20  ;;  %v798_v16 = vld [vmem:[#allocation11 + $0xc0] sm:$0xff]  ;;  %v800_v20 = vld [vmem:[#allocation11 + $0xd0] sm:$0xff] }
 0x222   :  { %1012 = vmatpush1.msra.mxu1 %v860_v21  ;;  %925 = vmatpush1.msra.mxu0 %v854_v22  ;;  %v795_v21 = vld [vmem:[#allocation11 + $0xa8] sm:$0xff]  ;;  %v797_v22 = vld [vmem:[#allocation11 + $0xb8] sm:$0xff] }
 0x223   :  { %1013 = vmatprep.subr.mxu1 %v857_v23  ;;  %926 = vmatprep.subr.mxu0 %v851_v24  ;;  %v794_v23 = vld [vmem:[#allocation11 + $0xa0] sm:$0xff]  ;;  %v796_v24 = vld [vmem:[#allocation11 + $0xb0] sm:$0xff] }
 0x224   :  { %1014 = vmatpush1.msra.mxu1 %v856_v25  ;;  %927 = vmatpush1.msra.mxu0 %v850_v26  ;;  %v793_v25 = vld [vmem:[#allocation11 + $0x98] sm:$0xff]  ;;  %v790_v26 = vld [vmem:[#allocation11 + $0x80] sm:$0xff] }
 0x225   :  { %1015 = vmatprep.subr.mxu1 %v853_v27  ;;  %928 = vmatprep.subr.mxu0 %v847_v28  ;;  %v792_v27 = vld [vmem:[#allocation11 + $0x90] sm:$0xff]  ;;  %v789_v28 = vld [vmem:[#allocation11 + $0x78] sm:$0xff] }
 0x226   :  { %1016 = vmatpush1.msra.mxu1 %v852_v29  ;;  %929 = vmatpush1.msra.mxu0 %v846_v30  ;;  %v786_v29 = vld [vmem:[#allocation11 + $0x60] sm:$0xff]  ;;  %v788_v30 = vld [vmem:[#allocation11 + $0x70] sm:$0xff] }
 0x227   :  { %1017 = vmatprep.subr.mxu1 %v849_v31  ;;  %930 = vmatprep.subr.mxu0 %v843_v32  ;;  %v783_v31 = vld [vmem:[#allocation11 + $0x48] sm:$0xff]  ;;  %v782_v32 = vld [vmem:[#allocation11 + $0x40] sm:$0xff] }
 0x228   :  { %1018 = vmatpush1.msra.mxu1 %v848_v33  ;;  %931 = vmatpush1.msra.mxu0 %v842_v34  ;;  %v784_v33 = vld [vmem:[#allocation11 + $0x50] sm:$0xff]  ;;  %v779_v34 = vld [vmem:[#allocation11 + $0x28] sm:$0xff] }
 0x229   :  { %1019 = vmatprep.subr.mxu1 %v845_v35  ;;  %932 = vmatprep.subr.mxu0 %v839_v36  ;;  %v781_v35 = vld [vmem:[#allocation11 + $0x38] sm:$0xff]  ;;  %v778_v36 = vld [vmem:[#allocation11 + $0x20] sm:$0xff] }
 0x22a   :  { %1020 = vmatpush1.msra.mxu1 %v844_v37  ;;  %933 = vmatpush1.msra.mxu0 %v838_v38  ;;  %v780_v37 = vld [vmem:[#allocation11 + $0x30] sm:$0xff]  ;;  %v775_v38 = vld [vmem:[#allocation11 + $0x8] sm:$0xff] }
 0x22b   :  { %1021 = vmatprep.subr.mxu1 %v841_v39  ;;  %966 = vmatprep.mubr.f32.mxu0 %v1828_v41  ;;  %v777_v39 = vld [vmem:[#allocation11 + $0x18] sm:$0xff] }
 0x22c   :  { %1022 = vmatpush1.msra.mxu1 %v840_v40  ;;  %1055 = vmatprep.mubr.f32.mxu1 %v1828_v41  ;;  %v774_v40 = vld [vmem:[#allocation11] sm:$0xff] }
 0x22d   :  { %967 = vmatmul.mubr.f32.vlgmr.msra.gmra.mxu0 %v1927_v4  ;;  %1056 = vmatmul.mubr.f32.vlgmr.msra.gmra.mxu1 %v1927_v4  ;;  %v822_v4 = vld [vmem:[#allocation11 + $0x180] sm:$0xff] }
 0x22e   :  { %1080 = vmatprep.subr.mxu0 %v835_v42  ;;  %1169 = vmatprep.subr.mxu1 %v837_v43  ;;  %v776_v42 = vld [vmem:[#allocation11 + $0x10] sm:$0xff]  ;;  %v1554_v43 = vpop.f32.mrf.mxu1 }
 0x22f   :  { %1081 = vmatpush1.msra.mxu0 %v834_v44  ;;  %1170 = vmatpush1.msra.mxu1 %v836_v45 }
 0x230   :  { %1082 = vmatprep.subr.mxu0 %v831_v46  ;;  %1171 = vmatprep.subr.mxu1 %v833_v47  ;;  %v549_v44 = vpop.f32.mrf.mxu1 }
 0x231   :  { %1083 = vmatpush1.msra.mxu0 %v830_v48  ;;  %1172 = vmatpush1.msra.mxu1 %v832_v49 }
 0x232   :  { %1084 = vmatprep.subr.mxu0 %v827_v50  ;;  %1173 = vmatprep.subr.mxu1 %v829_v51  ;;  %v1557_v45 = vpop.f32.mrf.mxu1 }
 0x233   :  { %1085 = vmatpush1.msra.mxu0 %v826_v52  ;;  %1174 = vmatpush1.msra.mxu1 %v828_v53 }
 0x234   :  { %1086 = vmatprep.subr.mxu0 %v823_v54  ;;  %1175 = vmatprep.subr.mxu1 %v825_v55  ;;  %v559_v46 = vpop.f32.mrf.mxu1 }
 0x235   :  { %1087 = vmatpush1.msra.mxu0 %v822_v4  ;;  %1176 = vmatpush1.msra.mxu1 %v824_v56  ;;  %v1357_v56 = vld [vmem:[%s2049_s6] ss:$0 sm:$0xff] }
 0x236   :  { %1088 = vmatprep.subr.mxu0 %v819_v57  ;;  %1177 = vmatprep.subr.mxu1 %v821_v58 }
 0x237   :  { %1089 = vmatpush1.msra.mxu0 %v818_v59  ;;  %1178 = vmatpush1.msra.mxu1 %v820_v60 }
 0x238   :  { %1090 = vmatprep.subr.mxu0 %v815_v61  ;;  %1179 = vmatprep.subr.mxu1 %v817_v62 }
 0x239   :  { %1091 = vmatpush1.msra.mxu0 %v814_v63  ;;  %1180 = vmatpush1.msra.mxu1 %v816_v0 }
 0x23a   :  { %1092 = vmatprep.subr.mxu0 %v811_v1  ;;  %1181 = vmatprep.subr.mxu1 %v813_v2 }
 0x23b   :  { %1093 = vmatpush1.msra.mxu0 %v810_v3  ;;  %1182 = vmatpush1.msra.mxu1 %v812_v5 }
 0x23c   :  { %1094 = vmatprep.subr.mxu0 %v807_v6  ;;  %1183 = vmatprep.subr.mxu1 %v809_v7 }
 0x23d   :  { %1095 = vmatpush1.msra.mxu0 %v806_v8  ;;  %1184 = vmatpush1.msra.mxu1 %v808_v9 }
 0x23e   :  { %1096 = vmatprep.subr.mxu0 %v803_v10  ;;  %1185 = vmatprep.subr.mxu1 %v805_v11 }
 0x23f   :  { %1097 = vmatpush1.msra.mxu0 %v802_v12  ;;  %1186 = vmatpush1.msra.mxu1 %v804_v13 }
 0x240   :  { %972 = vmatprep.mubr.f32.mxu0 %v1828_v41  ;;  %1061 = vmatprep.mubr.f32.mxu1 %v1828_v41 }
 0x241   :  { %1098 = vmatprep.subr.mxu0 %v799_v14  ;;  %1187 = vmatprep.subr.mxu1 %v801_v15 }
 0x242   :  { %973 = vmatmul.mubr.f32.gmra.mxu0 %v1930_v17  ;;  %1062 = vmatmul.mubr.f32.gmra.mxu1 %v1930_v17  ;;  %v791_v17 = vld [vmem:[#allocation11 + $0x88] sm:$0xff] }
 0x243   :  { %1099 = vmatpush1.msra.mxu0 %v798_v16  ;;  %1188 = vmatpush1.msra.mxu1 %v800_v20 }
 0x244   :  { %1100 = vmatprep.subr.mxu0 %v795_v21  ;;  %1189 = vmatprep.subr.mxu1 %v797_v22  ;;  %v1260_v21 = vlaneseq }
 0x245   :  { %978 = vmatprep.mubr.f32.mxu0 %v1828_v41  ;;  %1067 = vmatprep.mubr.f32.mxu1 %v1828_v41 }
 0x246   :  { %979 = vmatmul.mubr.f32.gmra.mxu0 %v1932_v18  ;;  %1068 = vmatmul.mubr.f32.gmra.mxu1 %v1932_v18  ;;  %v787_v18 = vld [vmem:[#allocation11 + $0x68] sm:$0xff] }
 0x247   :  { %984 = vmatprep.mubr.f32.mxu0 %v1828_v41  ;;  %1073 = vmatprep.mubr.f32.mxu1 %v1828_v41 }
 0x248   :  { %1101 = vmatpush1.msra.mxu0 %v794_v23  ;;  %1190 = vmatpush1.msra.mxu1 %v796_v24  ;;  %v1261_v24 = vshrl.u32 %v1260_v21, 7 }
 0x249   :  { %1102 = vmatprep.subr.mxu0 %v791_v17  ;;  %1191 = vmatprep.subr.mxu1 %v793_v25 }
 0x24a   :  { %985 = vmatmul.mubr.f32.gmra.mxu0 %v1936_v19  ;;  %1074 = vmatmul.mubr.f32.gmra.mxu1 %v1936_v19  ;;  %v785_v19 = vld [vmem:[#allocation11 + $0x58] sm:$0xff]  ;;  %v1262_v25 = vsub.s32 0, %v1261_v24 }
 0x24b   :  { %1103 = vmatpush1.msra.mxu0 %v790_v26  ;;  %1192 = vmatpush1.msra.mxu1 %v792_v27  ;;  %v1270_v26 = vsub.s32 2, %v1261_v24  ;;  %v1258_v27 = vld [vmem:[%s2052_s9] sm:$0xf]  ;;  %s1829_s9 = smov [#allocation14]  }
 0x24c   :  { %1104 = vmatprep.subr.mxu0 %v787_v18  ;;  %1193 = vmatprep.subr.mxu1 %v789_v28  ;;  %v1266_v18 = vsub.s32 1, %v1261_v24  ;;  %v1274_v28 = vsub.s32 3, %v1261_v24  ;;  %s1333_s30 = sshll.u32 %s1829_s9, 4  ;;  %s1334_s30 = int_to_ptr.vmem [resolvable:$true] %s1333_s30 }
 0x24d   :  { %1105 = vmatpush1.msra.mxu0 %v786_v29  ;;  %1194 = vmatpush1.msra.mxu1 %v788_v30  ;;  %s1787_s4 = scalar_lea.vmem %s1334_s30, 2048  ;;  %p1792_p8 = scmp.lt.s32.totalorder %s1334_s30, %s1334_s30 }
 0x24e   :  { %1106 = vmatprep.subr.mxu0 %v783_v31  ;;  %1195 = vmatprep.subr.mxu1 %v785_v19  ;;  %v2009_v31 = vrot.slane %v1258_v27, %v1262_v25  ;;  %v2011_v19 = vrot.slane %v1258_v27, %v1270_v26  ;;  %p1788_p7 = scmp.ne.s32.totalorder %s1334_s30, %s1787_s4  ;;  %p1793_p9 = scmp.lt.s32.totalorder %s1787_s4, %s1787_s4 }
 0x24f   :  { %1107 = vmatpush1.msra.mxu0 %v782_v32  ;;  %1196 = vmatpush1.msra.mxu1 %v784_v33 }
 0x250   :  { %1108 = vmatprep.subr.mxu0 %v779_v34  ;;  %1197 = vmatprep.subr.mxu1 %v781_v35  ;;  %p1794_p10 = por %p1793_p9, %p1792_p8 }
 0x251   :  { %1109 = vmatpush1.msra.mxu0 %v778_v36  ;;  %1198 = vmatpush1.msra.mxu1 %v780_v37  ;;  %v2013_v36 = vrot.slane %v1258_v27, %v1266_v18  ;;  %v2015_v37 = vrot.slane %v1258_v27, %v1274_v28 }
 0x252   :  { %1110 = vmatprep.subr.mxu0 %v775_v38  ;;  %1199 = vmatprep.subr.mxu1 %v777_v39  ;;  %p1795_p11 = pnand %p1794_p10, %p1788_p7 }
 0x253   :  { %1111 = vmatpush1.msra.mxu0 %v774_v40  ;;  %1144 = vmatprep.mubr.f32.mxu0 %v1828_v41 }
 0x254   :  { %1200 = vmatpush1.msra.mxu1 %v776_v42  ;;  %1233 = vmatprep.mubr.f32.mxu1 %v1828_v41 }
 0x2ca   :  { %v1592_v47 = vpop.f32.mrf.mxu0  ;;  %v1630_v48 = vpop.f32.mrf.mxu1 }
 0x2cb   :  { %v640_v49 = vadd.f32 %v1592_v47, %v1554_v43 }
 0x2cc   :  { %v634_v50 = vpop.f32.mrf.mxu0  ;;  %v736_v51 = vpop.f32.mrf.mxu1 }
 0x2cd   :  { %v635_v52 = vadd.f32 %v634_v50, %v549_v44  ;;  %v756_v54 = vadd.f32 %v1630_v48, %v640_v49 }
 0x2ce   :  { %v1595_v53 = vpop.f32.mrf.mxu0 }
 0x2cf   :  { %v755_v55 = vadd.f32 %v736_v51, %v635_v52  ;;  %v1633_v4 = vpop.f32.mrf.mxu1  ;;  %v767_v61 = vadd.f32 %v1357_v56, %v756_v54  ;;  %v650_v63 = vadd.f32 %v1595_v53, %v1557_v45 }
 0x2d0   :  { %v644_v57 = vpop.f32.mrf.mxu0 }
 0x2d1   :  { %v766_v58 = vadd.f32 %v1357_v56, %v755_v55  ;;  %v645_v59 = vadd.f32 %v644_v57, %v559_v46  ;;  %v746_v60 = vpop.f32.mrf.mxu1  ;;  %v771_v1 = vmax.f32 %v767_v61, 0.0  ;;  %v758_v2 = vadd.f32 %v1633_v4, %v650_v63 }
 0x2d3   :  { %v770_v62 = vmax.f32 %v766_v58, 0.0  ;;  %v757_v0 = vadd.f32 %v746_v60, %v645_v59  ;;  %v769_v5 = vadd.f32 %v1357_v56, %v758_v2 }
 0x2d5   :  { %1145 = vmatmul.mubr.f32.vlgmr.msra.gmra.mxu0 %v770_v62  ;;  %1234 = vmatmul.mubr.f32.vlgmr.msra.gmra.mxu1 %v770_v62  ;;  %v768_v3 = vadd.f32 %v1357_v56, %v757_v0  ;;  %v773_v7 = vmax.f32 %v769_v5, 0.0 }
 0x2d6   :  { %1150 = vmatprep.mubr.f32.mxu0 %v1828_v41  ;;  %1239 = vmatprep.mubr.f32.mxu1 %v1828_v41 }
 0x2d7   :  { %v772_v6 = vmax.f32 %v768_v3, 0.0 }
 0x2d9   :  { %1151 = vmatmul.mubr.f32.gmra.mxu0 %v771_v1  ;;  %1240 = vmatmul.mubr.f32.gmra.mxu1 %v771_v1 }
 0x2da   :  { %1156 = vmatprep.mubr.f32.mxu0 %v1828_v41  ;;  %1245 = vmatprep.mubr.f32.mxu1 %v1828_v41 }
 0x2dd   :  { %1157 = vmatmul.mubr.f32.gmra.mxu0 %v772_v6  ;;  %1246 = vmatmul.mubr.f32.gmra.mxu1 %v772_v6 }
 0x2de   :  { %1162 = vmatprep.mubr.f32.mxu0 %v1828_v41  ;;  %1251 = vmatprep.mubr.f32.mxu1 %v1828_v41 }
 0x2e1   :  { %1163 = vmatmul.mubr.f32.gmra.mxu0 %v773_v7  ;;  %1252 = vmatmul.mubr.f32.gmra.mxu1 %v773_v7 }
 0x2ed   :  { %v968_v8 = vpop.f32.mrf.mxu0  ;;  %v1057_v9 = vpop.f32.mrf.mxu1 }
 0x2ef   :  { %v970_v10 = vpop.f32.mrf.mxu0  ;;  %v1059_v11 = vpop.f32.mrf.mxu1 }
 0x302   :  { %v974_v12 = vpop.f32.mrf.mxu0  ;;  %v1063_v13 = vpop.f32.mrf.mxu1 }
 0x304   :  { %v976_v14 = vpop.f32.mrf.mxu0  ;;  %v1065_v15 = vpop.f32.mrf.mxu1 }
 0x306   :  { %v980_v16 = vpop.f32.mrf.mxu0  ;;  %v1069_v20 = vpop.f32.mrf.mxu1 }
 0x308   :  { %v982_v22 = vpop.f32.mrf.mxu0  ;;  %v1071_v23 = vpop.f32.mrf.mxu1 }
 0x30a   :  { %v1998_v17 = vpop.f32.mrf.mxu0  ;;  %v2000_v41 = vpop.f32.mrf.mxu1 }
 0x30c   :  { %v2005_v29 = vpop.f32.mrf.mxu0  ;;  %v2007_v30 = vpop.f32.mrf.mxu1 }
 0x395   :  { %v1146_v32 = vpop.f32.mrf.mxu0  ;;  %v1235_v33 = vpop.f32.mrf.mxu1 }
 0x396   :  { %v1147_v34 = vadd.f32 %v1146_v32, %v968_v8  ;;  %v1236_v35 = vadd.f32 %v1235_v33, %v1057_v9 }
 0x397   :  { %v1148_v38 = vpop.f32.mrf.mxu0  ;;  %v1237_v39 = vpop.f32.mrf.mxu1 }
 0x398   :  { %v1280_v40 = vadd.f32 %v2009_v31, %v1147_v34  ;;  %v1282_v42 = vadd.f32 %v2011_v19, %v1236_v35  ;;  %v1149_v43 = vadd.f32 %v1148_v38, %v970_v10  ;;  %v1238_v44 = vadd.f32 %v1237_v39, %v1059_v11 }
 0x399   :  { %v1152_v45 = vpop.f32.mrf.mxu0  ;;  %v1241_v46 = vpop.f32.mrf.mxu1 }
 0x39a   :  { %v1296_v47 = vmax.f32 %v1280_v40, 0.0  ;;  %v1298_v48 = vmax.f32 %v1282_v42, 0.0  ;;  %v1281_v49 = vadd.f32 %v2013_v36, %v1149_v43  ;;  %v1283_v50 = vadd.f32 %v2015_v37, %v1238_v44 }
 0x39b   :  { %v1153_v51 = vadd.f32 %v1152_v45, %v974_v12  ;;  %v1242_v52 = vadd.f32 %v1241_v46, %v1063_v13  ;;  %v1154_v53 = vpop.f32.mrf.mxu0  ;;  %v1243_v54 = vpop.f32.mrf.mxu1 }
 0x39c   :  { %1312 = vst [vmem:[#allocation14] sm:$0xff] %v1296_v47  ;;  %1314 = vst [vmem:[#allocation14 + $0x10] sm:$0xff] %v1298_v48  ;;  %v1297_v55 = vmax.f32 %v1281_v49, 0.0  ;;  %v1299_v4 = vmax.f32 %v1283_v50, 0.0  ;;  %v1155_v56 = vadd.f32 %v1154_v53, %v976_v14  ;;  %v1244_v57 = vadd.f32 %v1243_v54, %v1065_v15 }
 0x39d   :  { %v1284_v58 = vadd.f32 %v2009_v31, %v1153_v51  ;;  %v1286_v59 = vadd.f32 %v2011_v19, %v1242_v52  ;;  %v1158_v60 = vpop.f32.mrf.mxu0  ;;  %v1247_v61 = vpop.f32.mrf.mxu1 }
 0x39e   :  { %1313 = vst [vmem:[#allocation14 + $0x8] sm:$0xff] %v1297_v55  ;;  %1315 = vst [vmem:[#allocation14 + $0x18] sm:$0xff] %v1299_v4  ;;  %v1285_v62 = vadd.f32 %v2013_v36, %v1155_v56  ;;  %v1287_v63 = vadd.f32 %v2015_v37, %v1244_v57  ;;  %v1159_v0 = vadd.f32 %v1158_v60, %v980_v16 }
 0x39f   :  { %v1248_v1 = vadd.f32 %v1247_v61, %v1069_v20  ;;  %v1300_v2 = vmax.f32 %v1284_v58, 0.0  ;;  %v1302_v3 = vmax.f32 %v1286_v59, 0.0  ;;  %v1160_v5 = vpop.f32.mrf.mxu0  ;;  %v1249_v6 = vpop.f32.mrf.mxu1 }
 0x3a0   :  { %v1301_v7 = vmax.f32 %v1285_v62, 0.0  ;;  %v1303_v8 = vmax.f32 %v1287_v63, 0.0  ;;  %v1288_v9 = vadd.f32 %v2009_v31, %v1159_v0  ;;  %v1161_v11 = vadd.f32 %v1160_v5, %v982_v22 }
 0x3a1   :  { %v1290_v10 = vadd.f32 %v2011_v19, %v1248_v1  ;;  %1316 = vst [vmem:[#allocation14 + $0x20] sm:$0xff] %v1300_v2  ;;  %1318 = vst [vmem:[#allocation14 + $0x30] sm:$0xff] %v1302_v3  ;;  %v1250_v12 = vadd.f32 %v1249_v6, %v1071_v23  ;;  %v1164_v13 = vpop.f32.mrf.mxu0  ;;  %v1253_v14 = vpop.f32.mrf.mxu1 }
 0x3a2   :  { %1317 = vst [vmem:[#allocation14 + $0x28] sm:$0xff] %v1301_v7  ;;  %1319 = vst [vmem:[#allocation14 + $0x38] sm:$0xff] %v1303_v8  ;;  %v1304_v15 = vmax.f32 %v1288_v9, 0.0  ;;  %v1165_v20 = vadd.f32 %v1164_v13, %v1998_v17  ;;  %v1254_v21 = vadd.f32 %v1253_v14, %v2000_v41  ;;  %v1289_v24 = vadd.f32 %v2013_v36, %v1161_v11 }
 0x3a3   :  { %v1306_v16 = vmax.f32 %v1290_v10, 0.0  ;;  %v1291_v25 = vadd.f32 %v2015_v37, %v1250_v12  ;;  %v1166_v26 = vpop.f32.mrf.mxu0  ;;  %v1255_v27 = vpop.f32.mrf.mxu1 }
 0x3a4   :  { %1320 = vst [vmem:[#allocation14 + $0x40] sm:$0xff] %v1304_v15  ;;  %v1292_v22 = vadd.f32 %v2009_v31, %v1165_v20  ;;  %v1294_v23 = vadd.f32 %v2011_v19, %v1254_v21  ;;  %v1167_v18 = vadd.f32 %v1166_v26, %v2005_v29  ;;  %v1256_v28 = vadd.f32 %v1255_v27, %v2007_v30 }
 0x3a5   :  { %1322 = vst [vmem:[#allocation14 + $0x50] sm:$0xff] %v1306_v16  ;;  %v1305_v32 = vmax.f32 %v1289_v24, 0.0  ;;  %v1307_v17 = vmax.f32 %v1291_v25, 0.0 }
 0x3a6   :  { %v1308_v41 = vmax.f32 %v1292_v22, 0.0  ;;  %v1310_v33 = vmax.f32 %v1294_v23, 0.0  ;;  %v1293_v34 = vadd.f32 %v2013_v36, %v1167_v18  ;;  %v1295_v35 = vadd.f32 %v2015_v37, %v1256_v28 }
 0x3a7   :  { %1321 = vst [vmem:[#allocation14 + $0x48] sm:$0xff] %v1305_v32  ;;  %1323 = vst [vmem:[#allocation14 + $0x58] sm:$0xff] %v1307_v17 }
 0x3a8   :  { %1324 = vst [vmem:[#allocation14 + $0x60] sm:$0xff] %v1308_v41  ;;  %1326 = vst [vmem:[#allocation14 + $0x70] sm:$0xff] %v1310_v33  ;;  %v1309_v31 = vmax.f32 %v1293_v34, 0.0  ;;  %v1311_v19 = vmax.f32 %v1295_v35, 0.0 }
 0x3aa   :  { %1325 = vst [vmem:[#allocation14 + $0x68] sm:$0xff] %v1309_v31  ;;  %1327 = vst [vmem:[#allocation14 + $0x78] sm:$0xff] %v1311_v19 }
 0x3ab   :  { %1798 = shalt.err (!%p1795_p11)
}
 0x3ac   :  { %1339 = dma.vmem_to_hbm [thread:$0]  %s1334_s30, 2048, %s2053_s10, [#allocation4], %s1822_s1, %s1822_s1, %s1823_s28  }
 0x3ad   :  { %1815 = dma.done.wait [#allocation4], 2048  }
 0x3ae   :  { %1816 = vsyncadd [#allocation4], 4294965248 }
 0x3af   :  { %1343 = vsyncpa [#allocation3], 1 }
 0x3b0   :  { %1344 = vsyncpa [#allocation6], 1 }
 0x3b1   :  { %1345 = vsyncpa [#allocation9], 1 }
 0x3b2   :  { %1346 = vsyncpa [#allocation12], 1 }
 0x3b3   :  { %1347 = vsyncpa [#allocation4], 1 }

</bundles_post_ra>
